<compile_context>
chip_gen: v6e
topology: v6e:2x2x1
jax: 0.10.0
libtpu: 0.0.40
codegen_flags: <defaults>
</compile_context>

<pallas_src>
import functools

import numpy as np
import jax
import jax.numpy as jnp
from jax.experimental import pallas as pl
from jax.experimental.pallas import tpu as pltpu


def _round_up(x, m):
    return (x + m - 1) // m * m


def _cdiv(a, b):
    return (a + b - 1) // b


def _fused_embed_kernel(idx_ref, tab_ref, out_ref, *, v_offsets):
    """Fused multi-feature embedding lookup.

    idx_ref : (TN, F)      int32 -- raw category ids (offsets applied here)
    tab_ref : (Vp, sum_d)  f32   -- block-diagonal combined embedding table
    out_ref : (TN, sum_d)        -- concatenated embeddings
    v_offsets : static per-feature vocab offsets (Python ints)
    """
    idx = idx_ref[...]
    tn, num_feat = idx.shape
    vp = tab_ref.shape[0]

    col_ids = jax.lax.broadcasted_iota(jnp.int32, (tn, vp), 1)
    # Multi-hot over the concatenated vocab: vocab ranges are disjoint, so a
    # bool OR accumulation is exact; cast to the table dtype only once.
    hot = (idx[:, 0:1] + v_offsets[0]) == col_ids
    for f in range(1, num_feat):                 # static unroll, F is small
        hot = jnp.logical_or(hot, (idx[:, f:f + 1] + v_offsets[f]) == col_ids)
    onehot = hot.astype(tab_ref.dtype)

    # Block-diagonal table => one MXU matmul yields the concatenated embedding.
    out_ref[...] = jnp.dot(
        onehot, tab_ref[...], preferred_element_type=jnp.float32
    ).astype(out_ref.dtype)


class CategoricalEmbedding:
    """Pallas equivalent of CategoricalEmbedding (eval mode).

    Packs the per-feature tables into the block-diagonal combined table ONCE
    at construction (no per-call .at[].set() scatters).
    """

    def __init__(self, tables, emb_dropout=0.0, *, row_tile=1024, out_dtype=None):
        assert len(tables) > 0
        vocab_sizes = [int(t.shape[0]) for t in tables]
        emb_widths = [int(t.shape[1]) for t in tables]
        self.num_feat = len(tables)
        self.emb_size = int(np.sum(emb_widths))
        self.v_offsets = tuple(
            int(v) for v in np.concatenate([[0], np.cumsum(vocab_sizes)[:-1]]))
        d_offsets = [int(v) for v in np.concatenate([[0], np.cumsum(emb_widths)[:-1]])]

        sum_v = int(np.sum(vocab_sizes))
        vp = _round_up(sum_v, 8)          # sublane-aligned rows; NO 128-pad of K
        dtype = jnp.result_type(*[t.dtype for t in tables])

        combined = jnp.zeros((vp, self.emb_size), dtype)
        for t, vo, do in zip(tables, self.v_offsets, d_offsets):
            combined = combined.at[vo:vo + t.shape[0], do:do + t.shape[1]].set(
                t.astype(dtype))
        self.combined = combined          # cached; built exactly once
        self.row_tile = int(row_tile)
        self.out_dtype = dtype if out_dtype is None else out_dtype
        self.emb_dropout = float(emb_dropout)   # identity at inference

    def __call__(self, cat_data):
        lead_shape = cat_data.shape[:-1]
        num_feat = cat_data.shape[-1]
        assert num_feat == self.num_feat

        n_rows = int(np.prod(lead_shape, dtype=np.int64)) if lead_shape else 1
        idx = cat_data.reshape(n_rows, num_feat).astype(jnp.int32)

        vp, sum_d = self.combined.shape

        # Large row tile amortises ~0.35us/grid-step overhead, but keep the
        # grid >= ~4 steps so v7x's two TensorCores both get work.
        tn = max(8, min(self.row_tile, _round_up(_cdiv(n_rows, 4), 8)))
        grid = (_cdiv(n_rows, tn),)       # partial last block handled by Pallas

        kernel = functools.partial(_fused_embed_kernel, v_offsets=self.v_offsets)

        out = pl.pallas_call(
            kernel,
            out_shape=jax.ShapeDtypeStruct((n_rows, sum_d), self.out_dtype),
            grid=grid,
            in_specs=[
                pl.BlockSpec((tn, num_feat), lambda i: (i, 0)),  # index row tile
                pl.BlockSpec((vp, sum_d), lambda i: (0, 0)),     # resident table
            ],
            out_specs=pl.BlockSpec((tn, sum_d), lambda i: (i, 0)),
            compiler_params=pltpu.CompilerParams(
                dimension_semantics=("parallel",),   # megacore-shardable on v7x
            ),
        )(idx, self.combined)

        # emb_dropout_layer: identity at inference.
        return out.reshape(*lead_shape, sum_d)


def _reference_forward(cat_data, tables):
    """Pure-JAX reference (jnp.take gather) for correctness checking."""
    pieces = [jnp.take(t, cat_data[..., i].astype(jnp.int32), axis=0)
              for i, t in enumerate(tables)]
    return jnp.concatenate(pieces, axis=-1)


if __name__ == "__main__":
    # Module config: emb_dims = [(num_classes_i, emb_dim_i)], emb_size = 18.
    emb_dims = [(10, 4), (7, 6), (12, 8)]
    F = len(emb_dims)

    key = jax.random.PRNGKey(0)
    k_tab, k_seq, k_flat, k_rag = jax.random.split(key, 4)

    # nn.Embedding default init: weight ~ N(0, 1).
    tab_keys = jax.random.split(k_tab, F)
    tables = [jax.random.normal(tab_keys[i], (v, d), dtype=jnp.float32)
              for i, (v, d) in enumerate(emb_dims)]
    emb_size = int(np.sum([d for _, d in emb_dims], dtype=np.int32))

    layer = CategoricalEmbedding(tables, emb_dropout=0.1)

    def rand_ids(k, shape):
        ks = jax.random.split(k, F)
        return jnp.concatenate(
            [jax.random.randint(ks[i], shape + (1,), 0, emb_dims[i][0],
                                dtype=jnp.int32) for i in range(F)], axis=-1)

    # --- sequential input: (B, T, F) ---
    cat_seq = rand_ids(k_seq, (2, 8))
    out_seq = jax.block_until_ready(layer(cat_seq))
    assert out_seq.shape == (2, 8, emb_size), out_seq.shape
    np.testing.assert_allclose(np.asarray(out_seq),
                               np.asarray(_reference_forward(cat_seq, tables)),
                               rtol=1e-6, atol=1e-6)

    # --- non-sequential input: (B, F) ---
    cat_flat = rand_ids(k_flat, (2,))
    out_flat = jax.block_until_ready(layer(cat_flat))
    assert out_flat.shape == (2, emb_size), out_flat.shape
    np.testing.assert_allclose(np.asarray(out_flat),
                               np.asarray(_reference_forward(cat_flat, tables)),
                               rtol=1e-6, atol=1e-6)

    # --- ragged row count: exercises the partial last grid block ---
    cat_rag = rand_ids(k_rag, (5, 7))     # 35 rows, not a multiple of the tile
    out_rag = jax.block_until_ready(layer(cat_rag))
    assert out_rag.shape == (5, 7, emb_size), out_rag.shape
    np.testing.assert_allclose(np.asarray(out_rag),
                               np.asarray(_reference_forward(cat_rag, tables)),
                               rtol=1e-6, atol=1e-6)

    print("KERNEL_OK")
</pallas_src>

<mosaic_0001>
module attributes {stable_mosaic.version = 11 : i64} {
  func.func @_fused_embed_kernel(%arg0: i32, %arg1: memref<8x3xi32, #tpu.memory_space<vmem>>, %arg2: memref<32x18xf32, #tpu.memory_space<vmem>>, %arg3: memref<8x18xf32, #tpu.memory_space<vmem>>) attributes {dimension_semantics = [#tpu.dimension_semantics<parallel>], iteration_bounds = array<i64: 2>, scalar_prefetch = 0 : i64, scratch_operands = 0 : i64, tpu.core_type = #tpu.core_type<tc>, window_params = [{transform_indices = @transform_0, window_bounds = array<i64: 8, 3>}, {pipeline_mode = #tpu.pipeline_mode<synchronous>, transform_indices = @transform_1, window_bounds = array<i64: 32, 18>}, {transform_indices = @transform_2, window_bounds = array<i64: 8, 18>}]} {
    %c0 = arith.constant 0 : index
    %c0_0 = arith.constant 0 : index
    %0 = vector.load %arg1[%c0, %c0_0] : memref<8x3xi32, #tpu.memory_space<vmem>>, vector<8x3xi32>
    %1 = tpu.iota {dimensions = array<i32: 1>} : vector<8x32xi32>
    %2 = vector.extract_strided_slice %0 {offsets = [0, 0], sizes = [8, 1], strides = [1, 1]} : vector<8x3xi32> to vector<8x1xi32>
    %c0_i32 = arith.constant 0 : i32
    %3 = vector.broadcast %c0_i32 : i32 to vector<8x1xi32>
    %4 = arith.addi %2, %3 : vector<8x1xi32>
    %5 = vector.broadcast %4 : vector<8x1xi32> to vector<8x32xi32>
    %6 = arith.cmpi eq, %5, %1 : vector<8x32xi32>
    %7 = vector.extract_strided_slice %0 {offsets = [0, 1], sizes = [8, 1], strides = [1, 1]} : vector<8x3xi32> to vector<8x1xi32>
    %c10_i32 = arith.constant 10 : i32
    %8 = vector.broadcast %c10_i32 : i32 to vector<8x1xi32>
    %9 = arith.addi %7, %8 : vector<8x1xi32>
    %10 = vector.broadcast %9 : vector<8x1xi32> to vector<8x32xi32>
    %11 = arith.cmpi eq, %10, %1 : vector<8x32xi32>
    %12 = arith.ori %6, %11 : vector<8x32xi1>
    %13 = vector.extract_strided_slice %0 {offsets = [0, 2], sizes = [8, 1], strides = [1, 1]} : vector<8x3xi32> to vector<8x1xi32>
    %c17_i32 = arith.constant 17 : i32
    %14 = vector.broadcast %c17_i32 : i32 to vector<8x1xi32>
    %15 = arith.addi %13, %14 : vector<8x1xi32>
    %16 = vector.broadcast %15 : vector<8x1xi32> to vector<8x32xi32>
    %17 = arith.cmpi eq, %16, %1 : vector<8x32xi32>
    %18 = arith.ori %12, %17 : vector<8x32xi1>
    %19 = arith.extui %18 : vector<8x32xi1> to vector<8x32xi32>
    %20 = arith.sitofp %19 : vector<8x32xi32> to vector<8x32xf32>
    %c0_1 = arith.constant 0 : index
    %c0_2 = arith.constant 0 : index
    %21 = vector.load %arg2[%c0_1, %c0_2] : memref<32x18xf32, #tpu.memory_space<vmem>>, vector<32x18xf32>
    %cst = arith.constant dense<0.000000e+00> : vector<8x18xf32>
    %22 = tpu.matmul %20, %21, %cst {dimension_numbers = #tpu.dot_dimension_numbers<[1], [0], [0], [1], [0, 0, 1, 1], [], []>} : vector<8x32xf32>, vector<32x18xf32>, vector<8x18xf32> -> vector<8x18xf32>
    %c0_3 = arith.constant 0 : index
    %c0_4 = arith.constant 0 : index
    %23 = vector.load %arg3[%c0_3, %c0_4] : memref<8x18xf32, #tpu.memory_space<vmem>>, vector<8x18xf32>
    tpu.vector_store %arg3[%c0_3, %c0_4], %22 {strides = array<i32>} : memref<8x18xf32, #tpu.memory_space<vmem>>, vector<8x18xf32>,
    return
  }
  func.func @transform_0(%arg0: i32) -> (i32, i32) {
    %c0_i32 = arith.constant 0 : i32
    %c0_i32_0 = arith.constant 0 : i32
    return %arg0, %c0_i32 : i32, i32
  }
  func.func @transform_1(%arg0: i32) -> (i32, i32) {
    %c0_i32 = arith.constant 0 : i32
    %c0_i32_0 = arith.constant 0 : i32
    %c0_i32_1 = arith.constant 0 : i32
    return %c0_i32, %c0_i32_0 : i32, i32
  }
  func.func @transform_2(%arg0: i32) -> (i32, i32) {
    %c0_i32 = arith.constant 0 : i32
    %c0_i32_0 = arith.constant 0 : i32
    return %arg0, %c0_i32 : i32, i32
  }
}

</mosaic_0001>

<bundles_post_ra>
// kernel: tpu_custom_call.1
= control target key start
LH: loop header
LB: loop body
LE: loop exit
PB: predicated region body
PF: predicated region fallthrough
CT: control target
= control target key end

     0   :  { %7 = vsyncpa [#allocation3], 0  ;;  %s583_s0 = inlined_call_operand.vmem [shape: s32[16,3], index: 0, kind: input, shape index: {}]   ;;  %s584_s1 = inlined_call_operand.vmem [shape: f32[32,18], index: 1, kind: input, shape index: {}]   ;;  %s585_s2 = inlined_call_operand.hbm [shape: f32[16,18], index: 2, kind: output, shape index: {}]  }
   0x1   :  { %9 = vsyncpa [#allocation3 + $0x1], 0  ;;  %s472_s9 = smov 0   ;;  %s474_s10 = smov 0  }
   0x2   :  { %s476_s11 = smov 0   ;;  %s478_s12 = smov 0  }
   0x3 LB: > { %s493_s13 = sadd.s32 4294967295, %s449_s12   ;;  %s313_s14 = sadd.s32 4294967294, %s449_s12   ;;  %s449_s12 = sphi %s478_s12, %s591_s12   ;;  %s445_s11 = sphi %s476_s11, %s590_s11   ;;  %s441_s10 = sphi %s474_s10, %s589_s10   ;;  %s437_s9 = sphi %s472_s9, %s588_s9  }
   0x4   : > { %s497_s15 = sadd.s32 1, %s449_s12   ;;  %s69_s16 = sadd.s32 1, %s445_s11 }
   0x5   : > { %s66_s17 = ssub.s32 %s449_s12, %s497_s15  ;;  %p79_p0 = scmp.ne.s32.totalorder %s445_s11, %s441_s10 }
   0x6   : > { %p67_p1 = scmp.eq.s32.totalorder %s66_s17, 0  ;;  %p80_p2 = scmp.eq.s32.totalorder %s493_s13, 1 }
   0x7   : > { %p85_p3 = scmp.ne.s32.totalorder %s441_s10, %s437_s9  ;;  %p86_p4 = scmp.eq.s32.totalorder %s313_s14, 1 }
   0x8   : > { %s508_s18 = scalar_select %p67_p1, %s445_s11, %s69_s16  }
   0x9   : > { %p510_p5 = por %p80_p2, %p79_p0  ;;  %p514_p6 = por %p86_p4, %p85_p3 }
   0xa   : > { %p316_p7 = scmp.ge.s32.totalorder %s449_s12, 1  ;;  %p114_p8 = scmp.lt.s32.totalorder %s449_s12, 3 }
   0xc   : > { %p115_p9 = pnand %p316_p7, %p114_p8 }
   0xd   : > { %p135_p10 = scmp.lt.s32.totalorder (!%p115_p9), %s493_s13, 1  ;;  %s132_s6 = sand.u32 (!%p115_p9), 1, %s441_s10  }
   0xe   : > { %118 = sbr.rel (%p115_p9) target bundleno = 364 (0x16c), region = 28  ;;  %s317_s7 = sshll.u32 (!%p115_p9), %s132_s6, 3 }
   0xf   : > { %s322_s8 = sshll.u32 (!%p115_p9), %s493_s13, 7  ;;  %s134_s14 = scalar_lea.vmem (!%p115_p9), [#allocation2], %s317_s7 }
  0x10   : > { %s254_s16 = sshll.u32 (!%p115_p9), %s134_s14, 4  ;;  %s542_s22 = scalar_lea.hbm (!%p115_p9), %s585_s2, %s322_s8  ;;  %s544_s16 = int_to_ptr.vmem [resolvable:$true] %s254_s16 }
  0x11   : > { %s241_s23 = scalar_lea.sflag (!%p115_p9), [#allocation3], %s132_s6 }
  0x13   : > { %v451_v0 = vmov 0   ;;  %v452_v1 = vmov 2   ;;  %s136_s21 = scalar_select %p135_p10, %s493_s13, 1  ;;  %v163_v2 = vld [vmem:[%s584_s1 + $0x18] sm:$0xff]  ;;  %v453_v3 = vmov 0.0   ;;  %v162_v4 = vld [vmem:[%s584_s1 + $0x10] sm:$0xff]  ;;  %v140_v11 = vlaneseq }
  0x14   : > { %385 = vset.pattern.permute.xlu0 %v451_v0  ;;  %387 = vset.pattern.permute.xlu1 %v452_v1  ;;  %v161_v8 = vld [vmem:[%s584_s1 + $0x8] sm:$0xff]  ;;  %v160_v9 = vld [vmem:[%s584_s1] sm:$0xff]  ;;  %v454_v10 = vmov 1   ;;  %vm455_vm0 = vmmov 0   ;;  %vm164_vm5 = vcmask 261120   ;;  %vm238_vm7 = vcmask 146432  }
  0x15   : > { %s318_s24 = sshll.u32 %s136_s21, 3  ;;  %330 = vmatprep.subr.mxu0 %v453_v3  ;;  %338 = vmatprep.mubr.msk.f32.mxu0 %vm455_vm0, %v453_v3  ;;  %v141_v13 = vand.u32 127, %v140_v11  ;;  %s456_s13 = smov [#allocation2]  }
  0x16   : > { %s138_s29 = scalar_lea.vmem %s583_s0, %s318_s24  ;;  %331 = vmatpush3.msra.mxu0 %v163_v2  ;;  %s389_s24 = scalar_lea.vmem %s544_s16, 128 }
  0x17   : > { %v139_v5 = vld [vmem:[%s138_s29] sm:$0xff]  ;;  %332 = vmatprep.subr.mxu0 %v453_v3  ;;  %p390_p11 = scmp.ne.s32.totalorder %s544_s16, %s389_s24  ;;  %s393_s25 = sshll.u32 %s456_s13, 4  ;;  %s394_s25 = int_to_ptr.vmem [resolvable:$false] %s393_s25 }
  0x18   : > { %143 = vperm.xlu0 %385, %v139_v5   ;;  %v152_v6 = vadd.s32 17, %v139_v5  ;;  %333 = vmatpush3.msra.mxu0 %v162_v4  ;;  %v146_v7 = vadd.s32 10, %v139_v5  ;;  %s395_s26 = scalar_lea.vmem %s394_s25, 256  ;;  %p396_p0 = scmp.lt.s32.totalorder %s544_s16, %s394_s25 }
  0x19   : > { %334 = vmatprep.subr.mxu0 %v453_v3  ;;  %p391_p12 = pnand %p390_p11, %p510_p5  ;;  %p397_p1 = scmp.lt.s32.totalorder %s395_s26, %s389_s24 }
  0x1a   : > { %154 = vperm.xlu1 %387, %v152_v6   ;;  %335 = vmatpush3.msra.mxu0 %v161_v8 }
  0x1b   : > { %336 = vmatprep.subr.mxu0 %v453_v3  ;;  %p392_p13 = pneg %p391_p12  ;;  %p398_p2 = por %p397_p1, %p396_p0 }
  0x1c   : > { %386 = vset.pattern.permute.xlu0 %v454_v10  ;;  %337 = vmatpush3.msra.mxu0 %v160_v9 }
  0x1d   : > { %148 = vperm.xlu0 %386, %v146_v7   ;;  %p399_p3 = pnand %p398_p2, %p392_p13 }
  0x21   : > { %388 = vset.pattern.permute.xlu0 %v452_v1 }
  0x93   : > { %v144_v12 = vpop.permute.xlu0 %143 }
  0x94   : > { %vm145_vm2 = vcmp.eq.s32.totalorder %v144_v12, %v141_v13 }
  0x95   : > { %v155_v14 = vpop.permute.xlu1 %154 }
  0x96   : > { %vm156_vm1 = vcmp.eq.s32.totalorder %v155_v14, %v141_v13 }
  0x98   : > { %v149_v15 = vpop.permute.xlu0 %148 }
  0x99   : > { %vm150_vm3 = vcmp.eq.s32.totalorder %v149_v15, %v141_v13 }
  0x9a   : > { %vm151_vm4 = vmor %vm145_vm2, %vm150_vm3 }
  0x9b   : > { %vm157_vm6 = vmor %vm151_vm4, %vm156_vm1 }
  0x9c   : > { %v319_v16 = vsel %vm157_vm6, 1.0, %v453_v3 }
  0x9d   : > { %339 = vmatmul.mubr.msk.f32.vlgmr.msra.gmra.mxu0 %vm164_vm5, %v319_v16 }
 0x15d   : > { %v234_v17 = vpop.f32.mrf.mxu0 }
 0x15e   : > { %239 = vst.msk [vmem:[%s134_s14] sm:$0xff] %vm238_vm7, %v234_v17 }
 0x15f   : > { %v340_v18 = vpop.f32.mrf.mxu0 }
 0x160   : > { %402 = shalt.err (!%p399_p3)
}
 0x161   : > { %s403_s27 = scalar_lea.hbm %s542_s22, 128  ;;  %s407_s30 = scalar_lea.hbm %s585_s2, 256 }
 0x162   : > { %p404_p4 = scmp.ne.s32.totalorder %s542_s22, %s403_s27  ;;  %p408_p9 = scmp.lt.s32.totalorder %s542_s22, %s585_s2 }
 0x163   : > { %p409_p10 = scmp.lt.s32.totalorder %s407_s30, %s403_s27 }
 0x164   : > { %p405_p7 = pnand %p404_p4, %p510_p5 }
 0x165   : > { %p410_p11 = por %p409_p10, %p408_p9 }
 0x166   : > { %p406_p8 = pneg %p405_p7 }
 0x168   : > { %p411_p12 = pnand %p410_p11, %p406_p8 }
 0x16a   : > { %414 = shalt.err (!%p411_p12)
}
 0x16b   : > { %341 = dma.vmem_to_hbm [thread:$0]  (%p510_p5), %s544_s16, 128, %s542_s22, %s241_s23  }
 0x16c PF: > { %p347_p13 = scmp.ge.s32.totalorder %s449_s12, 2  ;;  %s266_s5 = sand.u32 1, %s437_s9  }
 0x16d   : > { %s267_s6 = scalar_lea.sflag [#allocation3], %s266_s5 }
 0x16e   : > { %p344_p0 = pnand %p347_p13, %p514_p6 }
 0x170   : > { %p345_p1 = pneg %p344_p0 }
 0x172   : > { %432 = dma.done.wait (%p345_p1), %s267_s6, 128  }
 0x173   : > { %434 = vsyncadd (%p345_p1), %s267_s6, 4294967168  ;;  %p12_p2 = scmp.ge.s32.totalorder %s497_s15, 4   ;;  %s588_s9 = smov %s441_s10 }
 0x174   : > { %s589_s10 = smov %s445_s11  ;;  %s590_s11 = smov %s508_s18 }
 0x175   : > { %s591_s12 = smov %s497_s15  ;;  %14 = sbr.rel (!%p12_p2) target bundleno = 3 (0x3), region = 63 }
 0x17a   :  { %272 = vsyncpa [#allocation3], 1 }
 0x17b   :  { %274 = vsyncpa [#allocation3 + $0x1], 1 }

</bundles_post_ra>
